<compile_context>
chip_gen: v6e
topology: v6e:2x2x1
jax: 0.10.0
libtpu: 0.0.40
codegen_flags: <defaults>
</compile_context>

<pallas_src>
import functools

import jax
import jax.numpy as jnp
from jax import lax
from jax.experimental import pallas as pl
from jax.experimental.pallas import tpu as pltpu


def _cls_loss_kernel(length_ref, target_ref, keys_ref, inpq_ref, loss_ref, *, seq_len):
    # length_ref : SMEM (B,) int32         (scalar prefetch)
    # target_ref : VMEM block (1, TQ, D)   bf16 query rows for this tile
    # keys_ref   : VMEM block (1, L,  D)   bf16 all key rows for this batch entry
    # inpq_ref   : VMEM block (1, TQ, D)   bf16 input rows matching the query tile
    # loss_ref   : VMEM block (1, 1, TQ)   f32 per-query loss (lane-dense store)
    b = pl.program_id(0)
    q = pl.program_id(1)
    length = length_ref[b]

    tq = target_ref.shape[1]
    q0 = pl.multiple_of(q * tq, tq)

    @pl.when(q0 < length)
    def _compute():
        t = target_ref[0]                       # (TQ, D) bf16
        x = keys_ref[0]                         # (L,  D) bf16
        l, d = x.shape

        # logit_t[j, i] = <target[q0 + i], input[j]>   (queries on the lane axis)
        logit_t = lax.dot_general(
            x, t, (((1,), (1,)), ((), ())),
            preferred_element_type=jnp.float32,
        )                                       # (L, TQ) f32

        # mask padded key positions j >= length (finite large-negative, so a
        # fully masked column gives exp->0 rather than inf-inf NaNs)
        key_idx = lax.broadcasted_iota(jnp.int32, (l, 1), 0)
        masked = jnp.where(key_idx >= length, -1e30, logit_t)

        # logsumexp over keys (sublane reduce) -> (1, TQ)
        m = jnp.max(masked, axis=0, keepdims=True)
        lse = m + jnp.log(jnp.sum(jnp.exp(masked - m), axis=0, keepdims=True))

        # diagonal = per-query dot of the target row with the matching input
        # row; the ones-matmul reduces over D while leaving queries in the
        # lane axis, so no transpose before the lane-dense store.  bf16
        # product keeps it consistent with the bf16 logit matmul.
        x_q = inpq_ref[0]                       # (TQ, D) bf16
        diag = lax.dot_general(
            jnp.ones((1, d), jnp.bfloat16), t * x_q,
            (((1,), (1,)), ((), ())),
            preferred_element_type=jnp.float32,
        )                                       # (1, TQ) f32

        loss = lse - diag                       # (1, TQ)

        # zero padded / out-of-range query rows (tail tiles hold garbage there)
        qry_idx = q0 + lax.broadcasted_iota(jnp.int32, (1, tq), 1)
        valid = jnp.logical_and(qry_idx < length, qry_idx < seq_len)
        loss_ref[0] = jnp.where(valid, loss, 0.0).astype(loss_ref.dtype)

    @pl.when(q0 >= length)
    def _skip():
        # fully padded query tile: skip all compute, just zero the output
        loss_ref[...] = jnp.zeros_like(loss_ref)


def _pick_query_tile(L):
    # Fixed MXU/lane-friendly tile; full-dim block only when L itself is small.
    if L <= 128:
        return L            # full-dim block is always legal
    if L >= 256:
        return 256          # v7x sweet spot; v6e could go 512, v5e prefers 128
    return 128


def classification_loss(inp, target, length=None, reduction="mean"):
    B, L, D = inp.shape
    if length is None:
        length = jnp.full((B,), L, dtype=jnp.int32)
    length = length.astype(jnp.int32)

    # Cast once in the wrapper: halves DMA bytes + VMEM, removes in-kernel casts.
    inp_bf = inp.astype(jnp.bfloat16)
    tgt_bf = target.astype(jnp.bfloat16)

    tq = _pick_query_tile(L)
    num_q = pl.cdiv(L, tq)

    kernel = functools.partial(_cls_loss_kernel, seq_len=L)

    cost = pl.CostEstimate(
        flops=2 * B * L * L * D + 2 * B * L * D,
        transcendentals=B * L * L,
        bytes_accessed=2 * (B * L * D * 2) + B * L * 4 + B * 4,
    )

    per_row = pl.pallas_call(
        kernel,
        out_shape=jax.ShapeDtypeStruct((B, 1, L), jnp.float32),
        grid_spec=pltpu.PrefetchScalarGridSpec(
            num_scalar_prefetch=1,
            grid=(B, num_q),
            in_specs=[
                # query rows of target for this tile
                pl.BlockSpec((1, tq, D), lambda b, q, length_ref: (b, q, 0)),
                # all key rows of input for this batch entry (reused across q)
                pl.BlockSpec((1, L, D), lambda b, q, length_ref: (b, 0, 0)),
                # input rows matching the query tile (for the diagonal)
                pl.BlockSpec((1, tq, D), lambda b, q, length_ref: (b, q, 0)),
            ],
            out_specs=pl.BlockSpec((1, 1, tq), lambda b, q, length_ref: (b, 0, q)),
        ),
        compiler_params=pltpu.CompilerParams(
            dimension_semantics=("parallel", "parallel"),
        ),
        cost_estimate=cost,
    )(length, tgt_bf, inp_bf, inp_bf)

    per_row = per_row[:, 0, :]   # (B, L)

    if reduction == "mean":
        n_valid = jnp.sum(jnp.minimum(length, L))
        return jnp.sum(per_row) / n_valid.astype(jnp.float32)
    elif reduction == "sum":
        return jnp.sum(per_row)
    elif reduction == "none":
        return per_row
    else:
        raise ValueError(f"{reduction} is not supported as reduction.")


def _reference_loss(inp, target, length, reduction="mean"):
    # Pure-JAX fp32 reference mirroring the PyTorch module.
    B, L, D = inp.shape
    pad = jnp.arange(L)[None, :] >= length[:, None]                     # (B, L)
    logit = jnp.einsum("bid,bjd->bij", target, inp,
                       precision=lax.Precision.HIGHEST)                 # (B, L, L)
    diag = jnp.diagonal(logit, axis1=-2, axis2=-1)                      # (B, L)
    logit = jnp.where(pad[:, None, :], -jnp.inf, logit)
    lse = jax.scipy.special.logsumexp(logit, axis=-1)                   # (B, L)
    loss = jnp.where(pad, 0.0, lse - diag)
    if reduction == "mean":
        return jnp.sum(loss) / jnp.sum(~pad)
    elif reduction == "sum":
        return jnp.sum(loss)
    return loss


if __name__ == "__main__":
    key = jax.random.PRNGKey(0)
    k1, k2, k3, k4 = jax.random.split(key, 4)

    # ---- small case (L <= 128 -> full-L query tile) ----
    B, L, D = 2, 8, 32
    inp = jax.random.normal(k1, (B, L, D), dtype=jnp.float32)
    target = jax.random.normal(k2, (B, L, D), dtype=jnp.float32)
    length = jnp.array([8, 5], dtype=jnp.int32)

    # reference uses the same bf16-rounded operands so the comparison isolates
    # kernel logic from the input quantization the wrapper applies
    inp_q = inp.astype(jnp.bfloat16).astype(jnp.float32)
    tgt_q = target.astype(jnp.bfloat16).astype(jnp.float32)

    out = jax.block_until_ready(classification_loss(inp, target, length, "mean"))
    ref = _reference_loss(inp_q, tgt_q, length, "mean")
    assert jnp.allclose(out, ref, rtol=5e-2, atol=5e-2), (out, ref)

    # default-length (length=None) path + 'none' reduction
    out_none = jax.block_until_ready(classification_loss(inp, target, None, "none"))
    ref_none = _reference_loss(inp_q, tgt_q, jnp.full((B,), L, jnp.int32), "none")
    assert jnp.allclose(out_none, ref_none, rtol=5e-2, atol=5e-2), (out_none, ref_none)

    # 'sum' reduction
    out_sum = jax.block_until_ready(classification_loss(inp, target, length, "sum"))
    ref_sum = _reference_loss(inp_q, tgt_q, length, "sum")
    assert jnp.allclose(out_sum, ref_sum, rtol=5e-2, atol=5e-2), (out_sum, ref_sum)

    # ---- tiled case (L > 128, not a tile multiple): exercises the cdiv grid,
    #      tail-query masking, and the pl.when padded-tile skip ----
    B2, L2, D2 = 2, 160, 64
    inp2 = jax.random.normal(k3, (B2, L2, D2), dtype=jnp.float32)
    target2 = jax.random.normal(k4, (B2, L2, D2), dtype=jnp.float32)
    length2 = jnp.array([160, 37], dtype=jnp.int32)
    inp2_q = inp2.astype(jnp.bfloat16).astype(jnp.float32)
    tgt2_q = target2.astype(jnp.bfloat16).astype(jnp.float32)

    out2 = jax.block_until_ready(classification_loss(inp2, target2, length2, "none"))
    ref2 = _reference_loss(inp2_q, tgt2_q, length2, "none")
    assert jnp.allclose(out2, ref2, rtol=5e-2, atol=5e-2), float(jnp.max(jnp.abs(out2 - ref2)))

    print("KERNEL_OK")
</pallas_src>

<mosaic_0001>
module attributes {stable_mosaic.version = 11 : i64} {
  func.func @_cls_loss_kernel(%arg0: i32, %arg1: i32, %arg2: memref<2xi32, #tpu.memory_space<smem>>, %arg3: memref<1x8x32xbf16, #tpu.memory_space<vmem>>, %arg4: memref<1x8x32xbf16, #tpu.memory_space<vmem>>, %arg5: memref<1x8x32xbf16, #tpu.memory_space<vmem>>, %arg6: memref<1x1x8xf32, #tpu.memory_space<vmem>>) attributes {dimension_semantics = [#tpu.dimension_semantics<parallel>, #tpu.dimension_semantics<parallel>], iteration_bounds = array<i64: 2, 1>, scalar_prefetch = 1 : i64, scratch_operands = 0 : i64, tpu.core_type = #tpu.core_type<tc>, window_params = [{transform_indices = @transform_0, window_bounds = array<i64: 1, 8, 32>}, {transform_indices = @transform_1, window_bounds = array<i64: 1, 8, 32>}, {transform_indices = @transform_2, window_bounds = array<i64: 1, 8, 32>}, {transform_indices = @transform_3, window_bounds = array<i64: 1, 1, 8>}]} {
    %0 = arith.index_cast %arg0 : i32 to index
    %1 = memref.load %arg2[%0] : memref<2xi32, #tpu.memory_space<smem>>
    %c8_i32 = arith.constant 8 : i32
    %2 = arith.muli %arg1, %c8_i32 : i32
    %3 = tpu.assume_multiple %2, 8 : i32
    %4 = arith.cmpi slt, %3, %1 : i32
    %5 = arith.extui %4 : i1 to i32
    %c0_i32 = arith.constant 0 : i32
    %6 = arith.cmpi ne, %5, %c0_i32 : i32
    scf.if %6 {
      %c0 = arith.constant 0 : index
      %c0_1 = arith.constant 0 : index
      %c0_2 = arith.constant 0 : index
      %10 = vector.load %arg3[%c0, %c0_1, %c0_2] : memref<1x8x32xbf16, #tpu.memory_space<vmem>>, vector<1x8x32xbf16>
      %11 = vector.shape_cast %10 : vector<1x8x32xbf16> to vector<8x32xbf16>
      %c0_3 = arith.constant 0 : index
      %c0_4 = arith.constant 0 : index
      %c0_5 = arith.constant 0 : index
      %12 = vector.load %arg4[%c0_3, %c0_4, %c0_5] : memref<1x8x32xbf16, #tpu.memory_space<vmem>>, vector<1x8x32xbf16>
      %13 = vector.shape_cast %12 : vector<1x8x32xbf16> to vector<8x32xbf16>
      %cst = arith.constant dense<0.000000e+00> : vector<8x8xf32>
      %14 = tpu.matmul %13, %11, %cst {dimension_numbers = #tpu.dot_dimension_numbers<[1], [1], [0], [0], [0, 0, 1, 0], [], []>} : vector<8x32xbf16>, vector<8x32xbf16>, vector<8x8xf32> -> vector<8x8xf32>
      %15 = tpu.iota {dimensions = array<i32: 0>} : vector<8x1xi32>
      %16 = vector.broadcast %1 : i32 to vector<8x1xi32>
      %17 = arith.cmpi sge, %15, %16 : vector<8x1xi32>
      %cst_6 = arith.constant -1.000000e+30 : f32
      %18 = vector.shape_cast %17 : vector<8x1xi1> to vector<8x1xi1>
      %19 = vector.broadcast %18 : vector<8x1xi1> to vector<8x8xi1>
      %20 = vector.broadcast %cst_6 : f32 to vector<8x8xf32>
      %21 = arith.select %19, %20, %14 : vector<8x8xi1>, vector<8x8xf32>
      %cst_7 = arith.constant dense<0xFF800000> : vector<8xf32>
      %22 = vector.multi_reduction <maximumf>, %21, %cst_7 [0] : vector<8x8xf32> to vector<8xf32>
      %23 = vector.shape_cast %22 : vector<8xf32> to vector<1x8xf32>
      %24 = vector.broadcast %23 : vector<1x8xf32> to vector<8x8xf32>
      %25 = arith.subf %21, %24 : vector<8x8xf32>
      %26 = math.exp %25 : vector<8x8xf32>
      %cst_8 = arith.constant dense<0.000000e+00> : vector<8xf32>
      %27 = vector.multi_reduction <add>, %26, %cst_8 [0] : vector<8x8xf32> to vector<8xf32>
      %28 = vector.shape_cast %27 : vector<8xf32> to vector<1x8xf32>
      %29 = math.log %28 : vector<1x8xf32>
      %30 = arith.addf %23, %29 : vector<1x8xf32>
      %c0_9 = arith.constant 0 : index
      %c0_10 = arith.constant 0 : index
      %c0_11 = arith.constant 0 : index
      %31 = vector.load %arg5[%c0_9, %c0_10, %c0_11] : memref<1x8x32xbf16, #tpu.memory_space<vmem>>, vector<1x8x32xbf16>
      %32 = vector.shape_cast %31 : vector<1x8x32xbf16> to vector<8x32xbf16>
      %cst_12 = arith.constant 1.000000e+00 : bf16
      %33 = vector.broadcast %cst_12 : bf16 to vector<1x32xbf16>
      %34 = arith.mulf %11, %32 : vector<8x32xbf16>
      %cst_13 = arith.constant dense<0.000000e+00> : vector<1x8xf32>
      %35 = tpu.matmul %33, %34, %cst_13 {dimension_numbers = #tpu.dot_dimension_numbers<[1], [1], [0], [0], [0, 0, 1, 0], [], []>} : vector<1x32xbf16>, vector<8x32xbf16>, vector<1x8xf32> -> vector<1x8xf32>
      %36 = arith.subf %30, %35 : vector<1x8xf32>
      %37 = tpu.iota {dimensions = array<i32: 1>} : vector<1x8xi32>
      %38 = vector.broadcast %3 : i32 to vector<1x8xi32>
      %39 = arith.addi %38, %37 : vector<1x8xi32>
      %40 = vector.broadcast %1 : i32 to vector<1x8xi32>
      %41 = arith.cmpi slt, %39, %40 : vector<1x8xi32>
      %c8_i32_14 = arith.constant 8 : i32
      %42 = vector.broadcast %c8_i32_14 : i32 to vector<1x8xi32>
      %43 = arith.cmpi slt, %39, %42 : vector<1x8xi32>
      %44 = arith.andi %41, %43 : vector<1x8xi1>
      %cst_15 = arith.constant 0.000000e+00 : f32
      %45 = vector.broadcast %cst_15 : f32 to vector<1x8xf32>
      %46 = arith.select %44, %36, %45 : vector<1x8xi1>, vector<1x8xf32>
      %c0_16 = arith.constant 0 : index
      %c0_17 = arith.constant 0 : index
      %c0_18 = arith.constant 0 : index
      %47 = vector.load %arg6[%c0_16, %c0_17, %c0_18] : memref<1x1x8xf32, #tpu.memory_space<vmem>>, vector<1x1x8xf32>
      %48 = vector.shape_cast %47 : vector<1x1x8xf32> to vector<1x8xf32>
      %49 = vector.shape_cast %46 : vector<1x8xf32> to vector<1x1x8xf32>
      tpu.vector_store %arg6[%c0_16, %c0_17, %c0_18], %49 {strides = array<i32>} : memref<1x1x8xf32, #tpu.memory_space<vmem>>, vector<1x1x8xf32>,
    } else {
    }
    %7 = arith.cmpi sge, %3, %1 : i32
    %8 = arith.extui %7 : i1 to i32
    %c0_i32_0 = arith.constant 0 : i32
    %9 = arith.cmpi ne, %8, %c0_i32_0 : i32
    scf.if %9 {
      %cst = arith.constant 0.000000e+00 : f32
      %10 = vector.broadcast %cst : f32 to vector<1x1x8xf32>
      %c0 = arith.constant 0 : index
      %c0_1 = arith.constant 0 : index
      %c0_2 = arith.constant 0 : index
      %11 = vector.load %arg6[%c0, %c0_1, %c0_2] : memref<1x1x8xf32, #tpu.memory_space<vmem>>, vector<1x1x8xf32>
      tpu.vector_store %arg6[%c0, %c0_1, %c0_2], %10 {strides = array<i32>} : memref<1x1x8xf32, #tpu.memory_space<vmem>>, vector<1x1x8xf32>,
    } else {
    }
    return
  }
  func.func @transform_0(%arg0: i32, %arg1: i32, %arg2: memref<2xi32, #tpu.memory_space<smem>>) -> (i32, i32, i32) {
    %c0_i32 = arith.constant 0 : i32
    %c0_i32_0 = arith.constant 0 : i32
    return %arg0, %arg1, %c0_i32 : i32, i32, i32
  }
  func.func @transform_1(%arg0: i32, %arg1: i32, %arg2: memref<2xi32, #tpu.memory_space<smem>>) -> (i32, i32, i32) {
    %c0_i32 = arith.constant 0 : i32
    %c0_i32_0 = arith.constant 0 : i32
    %c0_i32_1 = arith.constant 0 : i32
    return %arg0, %c0_i32, %c0_i32_0 : i32, i32, i32
  }
  func.func @transform_2(%arg0: i32, %arg1: i32, %arg2: memref<2xi32, #tpu.memory_space<smem>>) -> (i32, i32, i32) {
    %c0_i32 = arith.constant 0 : i32
    %c0_i32_0 = arith.constant 0 : i32
    return %arg0, %arg1, %c0_i32 : i32, i32, i32
  }
  func.func @transform_3(%arg0: i32, %arg1: i32, %arg2: memref<2xi32, #tpu.memory_space<smem>>) -> (i32, i32, i32) {
    %c0_i32 = arith.constant 0 : i32
    %c0_i32_0 = arith.constant 0 : i32
    return %arg0, %c0_i32, %arg1 : i32, i32, i32
  }
}

</mosaic_0001>

<bundles_post_ra>
// kernel: tpu_custom_call.1
= control target key start
LH: loop header
LB: loop body
LE: loop exit
PB: predicated region body
PF: predicated region fallthrough
CT: control target
= control target key end

     0   :  { %s865_s15 = smov [#allocation3]   ;;  %s1123_s0 = inlined_call_operand.hbm [shape: s32[2], index: 0, kind: input, shape index: {}]   ;;  %s1124_s1 = inlined_call_operand.hbm [shape: bf16[2,8,32], index: 1, kind: input, shape index: {}]   ;;  %s1125_s2 = inlined_call_operand.hbm [shape: bf16[2,8,32], index: 2, kind: input, shape index: {}]   ;;  %s1126_s3 = inlined_call_operand.hbm [shape: bf16[2,8,32], index: 3, kind: input, shape index: {}]   ;;  %s1127_s4 = inlined_call_operand.hbm [shape: f32[2,1,8], index: 4, kind: output, shape index: {}]  }
   0x1   :  { %1131 = sst [smem:[#allocation17_spill]] %s1125_s2 }
   0x2   :  { %10 = dma.hbm_to_smem %s1123_s0, 16, %s865_s15, [#allocation2] }
   0x3   :  { %827 = dma.done.wait [#allocation2], 16 }
   0x4   :  { %828 = vsyncadd [#allocation2], 4294967280 }
   0x5   :  { %12 = sfence }
   0x6   :  { %13 = vsyncpa [#allocation5], 0 }
   0x7   :  { %15 = vsyncpa [#allocation5 + $0x1], 0 }
   0x8   :  { %16 = vsyncpa [#allocation8], 0 }
   0x9   :  { %18 = vsyncpa [#allocation8 + $0x1], 0 }
   0xa   :  { %19 = vsyncpa [#allocation6], 0 }
   0xb   :  { %21 = vsyncpa [#allocation6 + $0x1], 0  ;;  %s902_s18 = smov 0   ;;  %s904_s19 = smov 0  }
   0xc   :  { %s906_s20 = smov 0   ;;  %s908_s21 = smov 0  }
   0xd   :  { %s910_s22 = smov 0   ;;  %s912_s0 = smov 0  }
   0xe LB: > { %1132 = sst [smem:[#allocation15_spill]] %s859_s22  ;;  %s933_s23 = sadd.s32 4294967295, %s863_s0   ;;  %s863_s0 = sphi %s912_s0, %s27_s0   ;;  %s859_s22 = sphi %s910_s22, %s1146_s22   ;;  %s855_s21 = sphi %s908_s21, %s1145_s21   ;;  %s851_s20 = sphi %s906_s20, %s1149_s20   ;;  %s847_s19 = sphi %s904_s19, %s1148_s19   ;;  %s843_s18 = sphi %s902_s18, %s1147_s18  }
   0xf   : > { %s566_s24 = sadd.s32 4294967294, %s863_s0   ;;  %s39_s25 = sadd.s32 1, %s859_s22 }
  0x10   : > { %s48_s26 = sadd.s32 1, %s851_s20  ;;  %p41_p0 = scmp.ge.s32.totalorder %s39_s25, 2 }
  0x11   : > { %p55_p1 = scmp.ne.s32.totalorder %s851_s20, %s847_s19  ;;  %p56_p2 = scmp.eq.s32.totalorder %s863_s0, 0 }
  0x12   : > { %p61_p3 = scmp.ne.s32.totalorder %s847_s19, %s843_s18  ;;  %s1151_s25 = smov (%p41_p0, %s39_s25), 0 }
  0x13   : > { %1133 = sst [smem:[#allocation16_spill]] %s1151_s25  ;;  %p945_p4 = por %p56_p2, %p55_p1 }
  0x14   : > { %p62_p5 = scmp.eq.s32.totalorder %s933_s23, 0  ;;  %s43_s28 = ssub.s32 %s859_s22, %s1151_s25 }
  0x15   : > { %p141_p6 = scmp.eq.s32.totalorder %s933_s23, 1  ;;  %p46_p7 = scmp.eq.s32.totalorder %s43_s28, 0 }
  0x16   : > { %p953_p8 = por %p62_p5, %p61_p3  ;;  %p147_p10 = scmp.eq.s32.totalorder %s566_s24, 1 }
  0x17   : > { %p957_p9 = por %p141_p6, %p55_p1  ;;  %p626_p13 = scmp.lt.s32.totalorder %s863_s0, 2 }
  0x18   : > { %s962_s5 = scalar_select %p46_p7, %s851_s20, %s48_s26  }
  0x19   : > { %p964_p11 = por %p147_p10, %p61_p3  ;;  %s1128_s7 = sand.u32 1, %s851_s20  }
  0x1a   : > { %s973_s8 = sshll.u32 %s1128_s7, 2  ;;  %s976_s9 = sshll.u32 %s859_s22, 6 }
  0x1b   : > { %p980_p0 = pnand %p626_p13, %p945_p4  ;;  %s186_s11 = sand.u32 1, %s863_s0  }
  0x1c   : > { %s1139_s2 = sld [smem:[#allocation17_spill]]  ;;  %s190_s15 = scalar_lea.vmem [#allocation7], %s973_s8 }
  0x1d   : > { %s197_s16 = sshll.u32 %s190_s15, 4  ;;  %p575_p1 = scmp.ge.s32.totalorder %s863_s0, 1  ;;  %s198_s16 = int_to_ptr.vmem [resolvable:$true] %s197_s16 }
  0x1e   : > { %p221_p2 = scmp.lt.s32.totalorder %s863_s0, 3  ;;  %s992_s17 = scalar_lea.sflag [#allocation8], %s186_s11 }
  0x1f   : > { %p695_p3 = pneg %p980_p0  ;;  %s706_s24 = scalar_lea.vmem %s198_s16, 64 }
  0x20   : > { %p707_p4 = scmp.ne.s32.totalorder %s198_s16, %s706_s24  ;;  %s866_s26 = smov [#allocation7]  }
  0x21   : > { %s711_s27 = sshll.u32 %s866_s26, 4  ;;  %s712_s27 = int_to_ptr.vmem [resolvable:$false] %s711_s27 }
  0x22   : > { %s195_s14 = scalar_lea.hbm %s1139_s2, %s976_s9  ;;  %p709_p5 = pnand %p707_p4, %p695_p3 }
  0x23   : > { %s713_s28 = scalar_lea.vmem %s712_s27, 128  ;;  %p714_p7 = scmp.lt.s32.totalorder %s198_s16, %s712_s27 }
  0x24   : > { %p710_p6 = pneg %p709_p5  ;;  %p715_p10 = scmp.lt.s32.totalorder %s713_s28, %s706_s24 }
  0x26   : > { %p716_p13 = por %p715_p10, %p714_p7 }
  0x28   : > { %p717_p12 = pnand %p716_p13, %p710_p6 }
  0x2a   : > { %720 = shalt.err (!%p717_p12)
}
  0x2b   : > { %618 = dma.hbm_to_vmem [thread:$0]  (!%p980_p0), %s195_s14, 64, %s198_s16, %s992_s17  }
  0x2c   : > { %p1006_p4 = pnand %p575_p1, %p221_p2  ;;  %s177_s15 = scalar_lea.hbm %s1124_s1, %s976_s9 }
  0x2d   : > { %s171_s24 = scalar_lea.vmem [#allocation4], %s973_s8  ;;  %s214_s7 = scalar_lea.hbm %s1126_s3, %s976_s9 }
  0x2e   : > { %s179_s26 = sshll.u32 %s171_s24, 4  ;;  %s1141_s2 = sand.u32 1, %s851_s20   ;;  %s180_s26 = int_to_ptr.vmem [resolvable:$true] %s179_s26 }
  0x2f   : > { %s168_s25 = scalar_lea.sflag [#allocation5], %s1141_s2  ;;  %s734_s14 = scalar_lea.vmem %s180_s26, 64 }
  0x30   : > { %p735_p12 = scmp.ne.s32.totalorder %s180_s26, %s734_s14  ;;  %s867_s16 = smov [#allocation4]  }
  0x31   : > { %s739_s22 = sshll.u32 %s867_s16, 4  ;;  %s740_s22 = int_to_ptr.vmem [resolvable:$false] %s739_s22 }
  0x32   : > { %p737_p1 = pnand %p735_p12, %p695_p3  ;;  %s741_s12 = scalar_lea.vmem %s740_s22, 128 }
  0x33   : > { %p742_p5 = scmp.lt.s32.totalorder %s180_s26, %s740_s22  ;;  %p743_p6 = scmp.lt.s32.totalorder %s741_s12, %s734_s14 }
  0x34   : > { %p738_p2 = pneg %p737_p1 }
  0x35   : > { %p744_p7 = por %p743_p6, %p742_p5 }
  0x37   : > { %p745_p10 = pnand %p744_p7, %p738_p2 }
  0x39   : > { %748 = shalt.err (!%p745_p10)
}
  0x3a   : > { %615 = dma.hbm_to_vmem [thread:$0]  (!%p980_p0), %s177_s15, 64, %s180_s26, %s168_s25  }
  0x3b   : > { %s208_s2 = scalar_lea.vmem [#allocation9], %s973_s8  ;;  %s868_s27 = smov [#allocation9]  }
  0x3c   : > { %s216_s13 = sshll.u32 %s208_s2, 4  ;;  %s767_s22 = sshll.u32 %s868_s27, 4  ;;  %s217_s13 = int_to_ptr.vmem [resolvable:$true] %s216_s13  ;;  %s768_s22 = int_to_ptr.vmem [resolvable:$false] %s767_s22 }
  0x3d   : > { %s762_s24 = scalar_lea.vmem %s217_s13, 64  ;;  %s769_s28 = scalar_lea.vmem %s768_s22, 128 }
  0x3e   : > { %p763_p13 = scmp.ne.s32.totalorder %s217_s13, %s762_s24  ;;  %p770_p2 = scmp.lt.s32.totalorder %s217_s13, %s768_s22 }
  0x3f   : > { %p771_p5 = scmp.lt.s32.totalorder %s769_s28, %s762_s24 }
  0x40   : > { %p765_p12 = pnand %p763_p13, %p695_p3 }
  0x41   : > { %p772_p6 = por %p771_p5, %p770_p2 }
  0x42   : > { %p766_p1 = pneg %p765_p12 }
  0x44   : > { %p773_p7 = pnand %p772_p6, %p766_p1 }
  0x46   : > { %776 = shalt.err (!%p773_p7)
}
  0x47   : > { %621 = dma.hbm_to_vmem [thread:$0]  (!%p980_p0), %s214_s7, 64, %s217_s13, %s992_s17  }
  0x48   : > { %225 = sbr.rel (%p1006_p4) target bundleno = 395 (0x18b), region = 32  ;;  %s1041_s15 = sand.u32 (!%p1006_p4), 1, %s847_s19  }
  0x49   : > { %s1044_s26 = sshll.u32 (!%p1006_p4), %s1041_s15, 2  ;;  %s228_s10 = scalar_lea.sflag (!%p1006_p4), [#allocation5], %s1041_s15 }
  0x4a   : > { %s231_s14 = scalar_lea.vmem (!%p1006_p4), [#allocation4], %s1044_s26 }
  0x4d   : > { %830 = dma.done.wait (%p953_p8), %s228_s10, 64  }
  0x4e   : > { %832 = vsyncadd (%p953_p8), %s228_s10, 4294967232  ;;  %s236_s7 = sand.u32 1, %s933_s23   ;;  %s240_s17 = scalar_lea.vmem [#allocation7], %s1044_s26 }
  0x4f   : > { %s237_s9 = scalar_lea.sflag [#allocation8], %s236_s7 }
  0x50   : > { %834 = dma.done.wait (%p953_p8), %s237_s9, 128  }
  0x51   : > { %836 = vsyncadd (%p953_p8), %s237_s9, 4294967168  ;;  %s1059_s11 = sld [smem:[#allocation3 + %s855_s21]]  ;;  %s249_s16 = scalar_lea.vmem [#allocation9], %s1044_s26 }
  0x52   : > { %s1063_s12 = scalar_lea.vmem [#allocation10], %s1041_s15 }
  0x57   : > { %p580_p0 = scmp.le.s32.totalorder %s1059_s11, 0 }
  0x59   : > { %288 = sbr.rel (%p580_p0) target bundleno = 363 (0x16b), region = 48 }
  0x5e   : > { %v289_v0 = vld [vmem:[%s231_s14] sm:$0xf]  ;;  %vm291_vm0 = vcmask 261120   ;;  %v869_v1 = vmov 0.0   ;;  %vm870_vm1 = vmmov 0   ;;  %v338_v8 = vlaneseq }
  0x5f   : > { %592 = vmatprep.subr.bf16.mxu0 %v869_v1  ;;  %v296_v2 = vsel %vm291_vm0, %v289_v0, 0  ;;  %594 = vmatprep.mubr.msk.bf16.mxu0 %vm870_vm1, %v869_v1  ;;  %v366_v3 = vld [vmem:[%s249_s16] sm:$0xf]  ;;  %v290_v6 = vld [vmem:[%s240_s17] sm:$0xf]  ;;  %v340_v10 = vstv %s1059_s11  ;;  %vm345_vm6 = vcmask 64512  }
  0x60   : > { %593 = vmatpush3.bf16.xpose.msra.mxu0 %v296_v2  ;;  %598 = vmatprep.subr.bf16.mxu1 %v869_v1  ;;  %v367_v4 = vmul.bf16 %v366_v3, %v289_v0  ;;  %v871_v7 = vmov 1065369472   ;;  %v416_v9 = vand.u32 127, %v338_v8  ;;  %v339_v12 = vshrl.u32 %v338_v8, 7 }
  0x61   : > { %600 = vmatprep.mubr.msk.bf16.mxu1 %vm870_vm1, %v869_v1  ;;  %vm423_vm7 = vcmask 57344  }
  0x62   : > { %v372_v5 = vsel %vm291_vm0, %v367_v4, 0  ;;  %vm419_vm2 = vcmp.lt.s32.totalorder %v416_v9, %v340_v10  ;;  %vm420_vm3 = vcmp.lt.s32.totalorder %v416_v9, 8  ;;  %vm341_vm5 = vcmp.ge.s32.totalorder %v339_v12, %v340_v10 }
  0x63   : > { %599 = vmatpush3.bf16.xpose.msra.mxu1 %v372_v5  ;;  %vm1071_vm4 = vmand %vm419_vm2, %vm420_vm3 }
  0x67   : > { %595 = vmatmul.mubr.msk.bf16.vlgmr.msra.gmra.mxu0 %vm291_vm0, %v290_v6 }
  0x6a   : > { %601 = vmatmul.mubr.msk.bf16.vlgmr.msra.gmra.mxu1 %vm291_vm0, %v871_v7 }
 0x127   : > { %v332_v13 = vpop.f32.mrf.mxu0 }
 0x128   : > { %v344_v14 = vsel %vm341_vm5, -1e+30, %v332_v13 }
 0x129   : > { %v346_v15 = vsel %vm345_vm6, %v344_v14, -inf  ;;  %v596_v16 = vpop.f32.mrf.mxu0 }
 0x12a   : > { %v347_v17 = vrot.slane %v346_v15, 4  ;;  %v408_v18 = vpop.f32.mrf.mxu1 }
 0x12b   : > { %v335_v19 = vpop.f32.mrf.mxu0 }
 0x12c   : > { %v348_v20 = vmax.f32 %v346_v15, %v347_v17  ;;  %v602_v21 = vpop.f32.mrf.mxu1 }
 0x12d   : > { %v597_v22 = vpop.f32.mrf.mxu0 }
 0x12e   : > { %v349_v23 = vrot.slane %v348_v20, 2  ;;  %v411_v24 = vpop.f32.mrf.mxu1 }
 0x130   : > { %v350_v25 = vmax.f32 %v348_v20, %v349_v23  ;;  %v603_v26 = vpop.f32.mrf.mxu1 }
 0x132   : > { %v351_v27 = vrot.slane %v350_v25, 1 }
 0x134   : > { %v352_v28 = vmax.f32 %v350_v25, %v351_v27 }
 0x136   : > { %v353_v29 = vsub.f32 %v344_v14, %v352_v28 }
 0x138   : > { %v354_v30 = vmul.f32 1.442695, %v353_v29 }
 0x13a   : > { %681 = vpow2.f32 %v354_v30 }
 0x147   : > { %v682_v31 = vpop.eup %681 }
 0x148   : > { %v356_v32 = vsel %vm345_vm6, %v682_v31, 0.0 }
 0x149   : > { %v357_v33 = vrot.slane %v356_v32, 4 }
 0x14b   : > { %v358_v34 = vadd.f32 %v357_v33, %v356_v32 }
 0x14d   : > { %v359_v35 = vrot.slane %v358_v34, 2 }
 0x14f   : > { %v360_v36 = vadd.f32 %v359_v35, %v358_v34 }
 0x151   : > { %v361_v37 = vrot.slane %v360_v36, 1 }
 0x153   : > { %v362_v38 = vadd.f32 %v361_v37, %v360_v36 }
 0x155   : > { %683 = vlog2.f32 %v362_v38 }
 0x162   : > { %v684_v39 = vpop.eup %683 }
 0x163   : > { %v364_v40 = vmul.f32 0.6931472, %v684_v39 }
 0x165   : > { %v365_v41 = vadd.f32 %v364_v40, %v352_v28 }
 0x167   : > { %v414_v42 = vsub.f32 %v365_v41, %v408_v18 }
 0x169   : > { %v422_v43 = vsel %vm1071_vm4, %v414_v42, 0.0 }
 0x16a   : > { %424 = vst.msk [vmem:[%s1063_s12] sm:$0x1] %vm423_vm7, %v422_v43 }
 0x16b PF: > { %p584_p8 = scmp.gt.s32.totalorder %s1059_s11, 0 }
 0x16d   : > { %428 = sbr.rel (%p584_p8) target bundleno = 372 (0x174), region = 52 }
 0x172   : > { %vm429_vm8 = vcmask 57344   ;;  %v872_v44 = vmov 0.0  }
 0x173   : > { %430 = vst.msk [vmem:[%s1063_s12] sm:$0x1] %vm429_vm8, %v872_v44 }
 0x174 PF: > { %s585_s23 = sshll.u32 %s855_s21, 4  ;;  %s445_s24 = sshll.u32 %s1063_s12, 4  ;;  %s446_s24 = int_to_ptr.vmem [resolvable:$true] %s445_s24 }
 0x175   : > { %s443_s13 = scalar_lea.hbm %s1127_s4, %s585_s23  ;;  %s432_s27 = scalar_lea.sflag [#allocation6], %s1041_s15 }
 0x176   : > { %s777_s22 = scalar_lea.vmem %s446_s24, 16  ;;  %s873_s28 = smov [#allocation10]  }
 0x177   : > { %p778_p3 = scmp.ne.s32.totalorder %s446_s24, %s777_s22  ;;  %s781_s25 = sshll.u32 %s873_s28, 4  ;;  %s782_s25 = int_to_ptr.vmem [resolvable:$false] %s781_s25 }
 0x178   : > { %s783_s8 = scalar_lea.vmem %s782_s25, 32  ;;  %p784_p13 = scmp.lt.s32.totalorder %s446_s24, %s782_s25 }
 0x179   : > { %p779_p4 = pnand %p778_p3, %p957_p9  ;;  %p785_p12 = scmp.lt.s32.totalorder %s783_s8, %s777_s22 }
 0x17b   : > { %p780_p10 = pneg %p779_p4  ;;  %p786_p1 = por %p785_p12, %p784_p13 }
 0x17d   : > { %p787_p2 = pnand %p786_p1, %p780_p10 }
 0x17f   : > { %790 = shalt.err (!%p787_p2)
}
 0x180   : > { %s791_s21 = scalar_lea.hbm %s443_s13, 16  ;;  %s795_s10 = scalar_lea.hbm %s1127_s4, 32 }
 0x181   : > { %p792_p5 = scmp.ne.s32.totalorder %s443_s13, %s791_s21  ;;  %p796_p0 = scmp.lt.s32.totalorder %s443_s13, %s1127_s4 }
 0x182   : > { %p797_p8 = scmp.lt.s32.totalorder %s795_s10, %s791_s21 }
 0x183   : > { %p793_p6 = pnand %p792_p5, %p957_p9 }
 0x184   : > { %p798_p3 = por %p797_p8, %p796_p0 }
 0x185   : > { %p794_p7 = pneg %p793_p6 }
 0x187   : > { %p799_p4 = pnand %p798_p3, %p794_p7 }
 0x189   : > { %802 = shalt.err (!%p799_p4)
}
 0x18a   : > { %610 = dma.vmem_to_hbm [thread:$0]  (%p957_p9), %s446_s24, 16, %s443_s13, %s432_s27  }
 0x18b PF: > { %s457_s9 = sand.u32 1, %s843_s18   ;;  %p1144_p10 = scmp.ge.s32.totalorder %s863_s0, 2 }
 0x18c   : > { %s458_s17 = scalar_lea.sflag [#allocation6], %s457_s9 }
 0x18d   : > { %p623_p13 = pnand %p1144_p10, %p964_p11 }
 0x18f   : > { %p624_p12 = pneg %p623_p13 }
 0x191   : > { %838 = dma.done.wait (%p624_p12), %s458_s17, 16  }
 0x192   : > { %840 = vsyncadd (%p624_p12), %s458_s17, 4294967280  ;;  %s27_s0 = sadd.s32 1, %s863_s0   ;;  %s1145_s21 = sld [smem:[#allocation15_spill]] }
 0x193   : > { %p24_p1 = scmp.ge.s32.totalorder %s27_s0, 4   ;;  %s1146_s22 = sld [smem:[#allocation16_spill]] }
 0x194   : > { %s1147_s18 = smov %s847_s19  ;;  %s1148_s19 = smov %s851_s20 }
 0x195   : > { %s1149_s20 = smov %s962_s5  ;;  %26 = sbr.rel (!%p24_p1) target bundleno = 14 (0xe), region = 109 }
 0x19a   :  { %462 = vsyncpa [#allocation5], 1 }
 0x19b   :  { %464 = vsyncpa [#allocation5 + $0x1], 1 }
 0x19c   :  { %465 = vsyncpa [#allocation8], 1 }
 0x19d   :  { %467 = vsyncpa [#allocation8 + $0x1], 1 }
 0x19e   :  { %468 = vsyncpa [#allocation6], 1 }
 0x19f   :  { %470 = vsyncpa [#allocation6 + $0x1], 1 }

</bundles_post_ra>
